<compile_context>
chip_gen: v5e
topology: v5e:2x2
jax: 0.10.0
libtpu: 0.0.40
codegen_flags: <defaults>
</compile_context>

<pallas_src>
import functools

import jax
import jax.numpy as jnp
from jax.experimental import pallas as pl
from jax.experimental.pallas import tpu as pltpu


def _layernorm_kernel(x_ref, w_ref, b_ref, o_ref, *, eps):
    # x_ref / o_ref: (C, TL) block (batch dim squeezed); w_ref / b_ref: (C, 1)
    x = x_ref[...].astype(jnp.float32)                   # (C, TL)
    u = jnp.mean(x, axis=0, keepdims=True)               # (1, TL)
    d = x - u
    s = jnp.mean(d * d, axis=0, keepdims=True)           # (1, TL)  biased variance
    inv = jax.lax.rsqrt(s + eps)
    y = d * inv                                          # (C, TL)
    w = w_ref[...].astype(jnp.float32)                   # (C, 1)
    b = b_ref[...].astype(jnp.float32)                   # (C, 1)
    o_ref[...] = (w * y + b).astype(o_ref.dtype)


def layernorm_channels_first(x, weight, bias, eps=1e-6, tl=512):
    """x: (B, C, L); weight, bias: (C,). Normalizes over the channel axis."""
    B, C, L = x.shape
    w2 = weight.reshape(C, 1)
    b2 = bias.reshape(C, 1)

    # Lane-tile size: multiple of 128, capped so a double-buffered f32 tile
    # (in + out) stays well inside every generation's scoped-VMEM budget.
    L_pad = ((L + 127) // 128) * 128
    tl = max(128, min(tl, L_pad))
    tl = (tl // 128) * 128
    L_pad = ((L_pad + tl - 1) // tl) * tl

    x_p = x if L_pad == L else jnp.pad(x, ((0, 0), (0, 0), (0, L_pad - L)))

    kernel = functools.partial(_layernorm_kernel, eps=eps)
    out = pl.pallas_call(
        kernel,
        out_shape=jax.ShapeDtypeStruct((B, C, L_pad), x.dtype),
        grid_spec=pltpu.PrefetchScalarGridSpec(
            num_scalar_prefetch=0,
            grid=(B, L_pad // tl),
            in_specs=[
                pl.BlockSpec((pl.Squeezed(), C, tl), lambda b, l: (b, 0, l)),
                pl.BlockSpec((C, 1), lambda b, l: (0, 0)),
                pl.BlockSpec((C, 1), lambda b, l: (0, 0)),
            ],
            out_specs=pl.BlockSpec((pl.Squeezed(), C, tl), lambda b, l: (b, 0, l)),
        ),
        compiler_params=pltpu.CompilerParams(
            dimension_semantics=("parallel", "parallel"),
        ),
    )(x_p, w2, b2)

    if L_pad != L:
        out = out[:, :, :L]
    return out


def _reference(x, weight, bias, eps=1e-6):
    u = jnp.mean(x, axis=1, keepdims=True)
    s = jnp.mean((x - u) ** 2, axis=1, keepdims=True)
    xn = (x - u) / jnp.sqrt(s + eps)
    return weight[None, :, None] * xn + bias[None, :, None]


if __name__ == "__main__":
    eps = 1e-6
    key = jax.random.PRNGKey(0)

    # Case 1: L a multiple of 128 (no padding path).
    B, C, L = 2, 32, 128
    k1, k2 = jax.random.split(key)
    x = jax.random.normal(k1, (B, C, L), dtype=jnp.float32)
    weight = jnp.ones((C,), dtype=jnp.float32)
    bias = jnp.zeros((C,), dtype=jnp.float32)

    out = layernorm_channels_first(x, weight, bias, eps=eps)
    out = jax.block_until_ready(out)
    ref = _reference(x, weight, bias, eps=eps)
    assert out.shape == (B, C, L)
    assert jnp.allclose(out, ref, atol=1e-5, rtol=1e-5), "mismatch vs reference (case 1)"

    # Case 2: L not a multiple of 128 (exercises the padding path).
    B2, C2, L2 = 2, 16, 200
    x2 = jax.random.normal(k2, (B2, C2, L2), dtype=jnp.float32)
    w2 = jax.random.normal(jax.random.PRNGKey(1), (C2,), dtype=jnp.float32)
    b2 = jax.random.normal(jax.random.PRNGKey(2), (C2,), dtype=jnp.float32)

    out2 = layernorm_channels_first(x2, w2, b2, eps=eps)
    out2 = jax.block_until_ready(out2)
    ref2 = _reference(x2, w2, b2, eps=eps)
    assert out2.shape == (B2, C2, L2)
    assert jnp.allclose(out2, ref2, atol=1e-5, rtol=1e-5), "mismatch vs reference (case 2)"

    print("KERNEL_OK")
</pallas_src>

<mosaic_0001>
module attributes {stable_mosaic.version = 11 : i64} {
  func.func @_layernorm_kernel(%arg0: i32, %arg1: i32, %arg2: memref<1x32x128xf32, #tpu.memory_space<vmem>>, %arg3: memref<32x1xf32, #tpu.memory_space<vmem>>, %arg4: memref<32x1xf32, #tpu.memory_space<vmem>>, %arg5: memref<1x32x128xf32, #tpu.memory_space<vmem>>) attributes {dimension_semantics = [#tpu.dimension_semantics<parallel>, #tpu.dimension_semantics<parallel>], iteration_bounds = array<i64: 2, 1>, scalar_prefetch = 0 : i64, scratch_operands = 0 : i64, tpu.core_type = #tpu.core_type<tc>, window_params = [{transform_indices = @transform_0, window_bounds = array<i64: 1, 32, 128>}, {pipeline_mode = #tpu.pipeline_mode<synchronous>, transform_indices = @transform_1, window_bounds = array<i64: 32, 1>}, {pipeline_mode = #tpu.pipeline_mode<synchronous>, transform_indices = @transform_2, window_bounds = array<i64: 32, 1>}, {transform_indices = @transform_3, window_bounds = array<i64: 1, 32, 128>}]} {
    %c0 = arith.constant 0 : index
    %c0_0 = arith.constant 0 : index
    %c0_1 = arith.constant 0 : index
    %0 = vector.load %arg2[%c0, %c0_0, %c0_1] : memref<1x32x128xf32, #tpu.memory_space<vmem>>, vector<1x32x128xf32>
    %1 = vector.shape_cast %0 : vector<1x32x128xf32> to vector<32x128xf32>
    %cst = arith.constant dense<0.000000e+00> : vector<128xf32>
    %2 = vector.multi_reduction <add>, %1, %cst [0] : vector<32x128xf32> to vector<128xf32>
    %3 = vector.shape_cast %2 : vector<128xf32> to vector<1x128xf32>
    %cst_2 = arith.constant 3.200000e+01 : f32
    %4 = vector.broadcast %cst_2 : f32 to vector<1x128xf32>
    %5 = arith.divf %3, %4 : vector<1x128xf32>
    %6 = vector.broadcast %5 : vector<1x128xf32> to vector<32x128xf32>
    %7 = arith.subf %1, %6 : vector<32x128xf32>
    %8 = arith.mulf %7, %7 : vector<32x128xf32>
    %cst_3 = arith.constant dense<0.000000e+00> : vector<128xf32>
    %9 = vector.multi_reduction <add>, %8, %cst_3 [0] : vector<32x128xf32> to vector<128xf32>
    %10 = vector.shape_cast %9 : vector<128xf32> to vector<1x128xf32>
    %cst_4 = arith.constant 3.200000e+01 : f32
    %11 = vector.broadcast %cst_4 : f32 to vector<1x128xf32>
    %12 = arith.divf %10, %11 : vector<1x128xf32>
    %cst_5 = arith.constant 9.99999997E-7 : f32
    %13 = vector.broadcast %cst_5 : f32 to vector<1x128xf32>
    %14 = arith.addf %12, %13 : vector<1x128xf32>
    %15 = math.rsqrt %14 : vector<1x128xf32>
    %16 = vector.broadcast %15 : vector<1x128xf32> to vector<32x128xf32>
    %17 = arith.mulf %7, %16 : vector<32x128xf32>
    %c0_6 = arith.constant 0 : index
    %c0_7 = arith.constant 0 : index
    %18 = vector.load %arg3[%c0_6, %c0_7] : memref<32x1xf32, #tpu.memory_space<vmem>>, vector<32x1xf32>
    %c0_8 = arith.constant 0 : index
    %c0_9 = arith.constant 0 : index
    %19 = vector.load %arg4[%c0_8, %c0_9] : memref<32x1xf32, #tpu.memory_space<vmem>>, vector<32x1xf32>
    %20 = vector.broadcast %18 : vector<32x1xf32> to vector<32x128xf32>
    %21 = arith.mulf %20, %17 : vector<32x128xf32>
    %22 = vector.broadcast %19 : vector<32x1xf32> to vector<32x128xf32>
    %23 = arith.addf %21, %22 : vector<32x128xf32>
    %c0_10 = arith.constant 0 : index
    %c0_11 = arith.constant 0 : index
    %c0_12 = arith.constant 0 : index
    %24 = vector.load %arg5[%c0_10, %c0_11, %c0_12] : memref<1x32x128xf32, #tpu.memory_space<vmem>>, vector<1x32x128xf32>
    %25 = vector.shape_cast %24 : vector<1x32x128xf32> to vector<32x128xf32>
    %26 = vector.shape_cast %23 : vector<32x128xf32> to vector<1x32x128xf32>
    tpu.vector_store %arg5[%c0_10, %c0_11, %c0_12], %26 {strides = array<i32>} : memref<1x32x128xf32, #tpu.memory_space<vmem>>, vector<1x32x128xf32>,
    return
  }
  func.func @transform_0(%arg0: i32, %arg1: i32) -> (i32, i32, i32) {
    %c0_i32 = arith.constant 0 : i32
    %c0_i32_0 = arith.constant 0 : i32
    return %arg0, %c0_i32, %arg1 : i32, i32, i32
  }
  func.func @transform_1(%arg0: i32, %arg1: i32) -> (i32, i32) {
    %c0_i32 = arith.constant 0 : i32
    %c0_i32_0 = arith.constant 0 : i32
    %c0_i32_1 = arith.constant 0 : i32
    return %c0_i32, %c0_i32_0 : i32, i32
  }
  func.func @transform_2(%arg0: i32, %arg1: i32) -> (i32, i32) {
    %c0_i32 = arith.constant 0 : i32
    %c0_i32_0 = arith.constant 0 : i32
    %c0_i32_1 = arith.constant 0 : i32
    return %c0_i32, %c0_i32_0 : i32, i32
  }
  func.func @transform_3(%arg0: i32, %arg1: i32) -> (i32, i32, i32) {
    %c0_i32 = arith.constant 0 : i32
    %c0_i32_0 = arith.constant 0 : i32
    return %arg0, %c0_i32, %arg1 : i32, i32, i32
  }
}

</mosaic_0001>

<bundles_post_ra>
// kernel: tpu_custom_call.1
= control target key start
LH: loop header
LB: loop body
LE: loop exit
PB: predicated region body
PF: predicated region fallthrough
CT: control target
= control target key end

     0   :  { %8 = vsyncpa [#allocation3], 0  ;;  %s713_s0 = inlined_call_operand.vmem [shape: f32[2,32,128], index: 0, kind: input, shape index: {}]   ;;  %s714_s1 = inlined_call_operand.vmem [shape: f32[32,1], index: 1, kind: input, shape index: {}]   ;;  %s715_s2 = inlined_call_operand.vmem [shape: f32[32,1], index: 2, kind: input, shape index: {}]   ;;  %s716_s3 = inlined_call_operand.hbm [shape: f32[2,32,128], index: 3, kind: output, shape index: {}]  }
   0x1   :  { %10 = vsyncpa [#allocation3 + $0x1], 0  ;;  %s588_s12 = smov 0   ;;  %s590_s13 = smov 0  }
   0x2   :  { %s592_s14 = smov 0   ;;  %s594_s15 = smov 0  }
   0x3   :  { %s596_s16 = smov 0   ;;  %s598_s17 = smov 0  }
   0x4 LB: > { %s403_s18 = sadd.s32 4294967295, %s562_s17   ;;  %s404_s19 = sadd.s32 4294967294, %s562_s17   ;;  %s562_s17 = sphi %s598_s17, %s16_s17   ;;  %s558_s16 = sphi %s596_s16, %s723_s16   ;;  %s554_s15 = sphi %s594_s15, %s722_s15   ;;  %s550_s14 = sphi %s592_s14, %s721_s14   ;;  %s546_s13 = sphi %s590_s13, %s720_s13   ;;  %s542_s12 = sphi %s588_s12, %s719_s12  }
   0x5   : > { %s28_s20 = sadd.s32 1, %s558_s16  ;;  %s107_s21 = sadd.s32 1, %s550_s14 }
   0x6   : > { %p30_p0 = scmp.ge.s32.totalorder %s28_s20, 2  ;;  %p117_p1 = scmp.ne.s32.totalorder %s550_s14, %s546_s13 }
   0x7   : > { %p118_p2 = scmp.eq.s32.totalorder %s403_s18, 1  ;;  %p123_p3 = scmp.ne.s32.totalorder %s546_s13, %s542_s12 }
   0x8   : > { %s725_s20 = smov (%p30_p0, %s28_s20), 0  ;;  %p124_p5 = scmp.eq.s32.totalorder %s404_s19, 1 }
   0x9   : > { %p628_p4 = por %p118_p2, %p117_p1  ;;  %s102_s23 = ssub.s32 %s558_s16, %s725_s20 }
   0xa   : > { %p407_p6 = scmp.ge.s32.totalorder %s562_s17, 1  ;;  %p105_p7 = scmp.eq.s32.totalorder %s102_s23, 0 }
   0xb   : > { %p635_p8 = por %p124_p5, %p123_p3  ;;  %p159_p9 = scmp.lt.s32.totalorder %s562_s17, 3 }
   0xc   : > { %s641_s25 = scalar_select %p105_p7, %s550_s14, %s107_s21  }
   0xd   : > { %p160_p10 = pnand %p407_p6, %p159_p9 }
   0xe   : > { %p186_p11 = scmp.lt.s32.totalorder (!%p160_p10), %s554_s15, 1  ;;  %s183_s30 = sand.u32 (!%p160_p10), 1, %s546_s13  }
   0xf   : > { %163 = sbr.rel (%p160_p10) target bundleno = 160 (0xa0), region = 32  ;;  %s408_s4 = sshll.u32 (!%p160_p10), %s183_s30, 5 }
  0x10   : > { %s185_s5 = scalar_lea.vmem (!%p160_p10), [#allocation2], %s408_s4  ;;  %s417_s6 = sshll.u32 (!%p160_p10), %s554_s15, 5 }
  0x11   : > { %s322_s10 = sshll.u32 (!%p160_p10), %s185_s5, 4  ;;  %s504_s26 = scalar_lea.hbm (!%p160_p10), %s716_s3, 64  ;;  %s323_s10 = int_to_ptr.vmem [resolvable:$true] %s322_s10 }
  0x14   : > { %v250_v0 = vld [vmem:[%s714_s1 + $0x10] sm:$0xff]  ;;  %v248_v1 = vld [vmem:[%s714_s1] sm:$0xff]  ;;  %v564_v2 = vmov 0   ;;  %v251_v4 = vld [vmem:[%s714_s1 + $0x18] sm:$0xff]  ;;  %s187_s9 = scalar_select %p186_p11, %s554_s15, 1  ;;  %v565_v14 = vmov 32.0  }
  0x15   : > { %478 = vset.pattern.permute.xlu1 %v564_v2  ;;  %477 = vset.pattern.permute.xlu0 %v564_v2  ;;  %v252_v3 = vld [vmem:[%s715_s2] sm:$0xff]  ;;  %v249_v5 = vld [vmem:[%s714_s1 + $0x8] sm:$0xff]  ;;  %v255_v7 = vld [vmem:[%s715_s2 + $0x18] sm:$0xff]  ;;  %480 = vrcp.f32 %v565_v14  ;;  %s309_s15 = scalar_lea.sflag [#allocation3], %s183_s30 }
  0x16   : > { %268 = vperm.xlu1 %478, %v250_v0   ;;  %258 = vperm.xlu0 %477, %v248_v1   ;;  %v253_v6 = vld [vmem:[%s715_s2 + $0x8] sm:$0xff]  ;;  %s416_s18 = sshll.u32 %s187_s9, 5  ;;  %v254_v8 = vld [vmem:[%s715_s2 + $0x10] sm:$0xff]  ;;  %s321_s9 = scalar_lea.hbm %s716_s3, %s417_s6 }
  0x17   : > { %479 = vset.pattern.permute.xlu2 %v564_v2  ;;  %s193_s29 = scalar_lea.vmem %s713_s0, %s416_s18  ;;  %s324_s11 = sshll.u32 %s321_s9, 4  ;;  %s325_s11 = int_to_ptr.hbm [resolvable:$true] %s324_s11 }
  0x18   : > { %282 = vperm.xlu2 %479, %v252_v3   ;;  %v194_v9 = vld [vmem:[%s193_s29] sm:$0xff]  ;;  %v195_v10 = vld [vmem:[%s193_s29 + $0x8] sm:$0xff]  ;;  %v196_v12 = vld [vmem:[%s193_s29 + $0x10] sm:$0xff]  ;;  %s498_s18 = sshra.s32 %s325_s11, 4  ;;  %s499_s18 = int_to_ptr.hbm [resolvable:$true] %s498_s18 }
  0x19   : > { %v198_v11 = vadd.f32 %v195_v10, %v194_v9  ;;  %v197_v15 = vld [vmem:[%s193_s29 + $0x18] sm:$0xff]  ;;  %s500_s19 = scalar_lea.hbm %s499_s18, 32  ;;  %p505_p1 = scmp.lt.s32.totalorder %s499_s18, %s716_s3 }
  0x1a   : > { %p501_p12 = scmp.ne.s32.totalorder %s499_s18, %s500_s19  ;;  %p506_p2 = scmp.lt.s32.totalorder %s504_s26, %s500_s19 }
  0x1b   : > { %v199_v13 = vadd.f32 %v198_v11, %v196_v12  ;;  %v481_v18 = vpop.eup %480 }
  0x1c   : > { %v208_v20 = vmul.f32 32.0, %v481_v18  ;;  %vm212_vm0 = vweird.f32 %v481_v18  ;;  %p502_p13 = pnand %p501_p12, %p628_p4  ;;  %p507_p3 = por %p506_p2, %p505_p1 }
  0x1d   : > { %v200_v16 = vadd.f32 %v199_v13, %v197_v15 }
  0x1e   : > { %273 = vperm.xlu1 %478, %v251_v4   ;;  %263 = vperm.xlu0 %477, %v249_v5   ;;  %v209_v22 = vsub.f32 1.0, %v208_v20  ;;  %p503_p0 = pneg %p502_p13 }
  0x1f   : > { %v201_v17 = vrot.slane %v200_v16, 4 }
  0x20   : > { %287 = vperm.xlu2 %479, %v253_v6   ;;  %v210_v24 = vmul.f32 %v481_v18, %v209_v22  ;;  %p508_p5 = pnand %p507_p3, %p503_p0 }
  0x21   : > { %v202_v19 = vadd.f32 %v201_v17, %v200_v16 }
  0x22   : > { %v211_v26 = vadd.f32 %v481_v18, %v210_v24 }
  0x23   : > { %v203_v21 = vrot.slane %v202_v19, 2 }
  0x24   : > { %v213_v28 = vsel %vm212_vm0, %v481_v18, %v211_v26 }
  0x25   : > { %v204_v23 = vadd.f32 %v203_v21, %v202_v19 }
  0x26   : > { %297 = vperm.xlu1 %478, %v255_v7   ;;  %292 = vperm.xlu0 %477, %v254_v8  }
  0x27   : > { %v205_v25 = vrot.slane %v204_v23, 1 }
  0x29   : > { %v206_v27 = vadd.f32 %v205_v25, %v204_v23 }
  0x2b   : > { %v214_v29 = vmul.f32 %v213_v28, %v206_v27 }
  0x2d   : > { %v215_v30 = vsub.f32 %v194_v9, %v214_v29  ;;  %v216_v31 = vsub.f32 %v195_v10, %v214_v29  ;;  %v217_v32 = vsub.f32 %v196_v12, %v214_v29  ;;  %v218_v35 = vsub.f32 %v197_v15, %v214_v29 }
  0x2f   : > { %v219_v33 = vmul.f32 %v215_v30, %v215_v30  ;;  %v220_v34 = vmul.f32 %v216_v31, %v216_v31  ;;  %v221_v36 = vmul.f32 %v217_v32, %v217_v32  ;;  %v222_v38 = vmul.f32 %v218_v35, %v218_v35 }
  0x31   : > { %v223_v37 = vadd.f32 %v220_v34, %v219_v33 }
  0x33   : > { %v224_v39 = vadd.f32 %v223_v37, %v221_v36 }
  0x35   : > { %v225_v40 = vadd.f32 %v224_v39, %v222_v38 }
  0x37   : > { %v226_v41 = vrot.slane %v225_v40, 4 }
  0x39   : > { %v227_v42 = vadd.f32 %v226_v41, %v225_v40 }
  0x3b   : > { %v228_v43 = vrot.slane %v227_v42, 2 }
  0x3d   : > { %v229_v44 = vadd.f32 %v228_v43, %v227_v42 }
  0x3f   : > { %v230_v45 = vrot.slane %v229_v44, 1 }
  0x41   : > { %v231_v46 = vadd.f32 %v230_v45, %v229_v44 }
  0x43   : > { %v232_v47 = vmul.f32 %v231_v46, %v213_v28 }
  0x45   : > { %v233_v48 = vadd.f32 1e-06, %v232_v47 }
  0x47   : > { %482 = vrsqrt.f32 %v233_v48  ;;  %vm240_vm1 = vweird.f32 %v233_v48 }
  0x4d   : > { %v483_v49 = vpop.eup %482 }
  0x4e   : > { %v235_v50 = vmul.f32 %v483_v49, %v233_v48  ;;  %vm241_vm2 = vweird.f32 %v483_v49 }
  0x4f   : > { %vm242_vm3 = vmor %vm240_vm1, %vm241_vm2 }
  0x50   : > { %v236_v51 = vmul.f32 %v483_v49, %v235_v50 }
  0x52   : > { %v237_v52 = vmul.f32 0.5, %v236_v51 }
  0x54   : > { %v238_v53 = vsub.f32 1.5, %v237_v52 }
  0x56   : > { %v239_v54 = vmul.f32 %v483_v49, %v238_v53 }
  0x58   : > { %v243_v55 = vsel %vm242_vm3, %v483_v49, %v239_v54 }
  0x59   : > { %v244_v56 = vmul.f32 %v243_v55, %v215_v30  ;;  %v245_v62 = vmul.f32 %v243_v55, %v216_v31  ;;  %v246_v3 = vmul.f32 %v243_v55, %v217_v32  ;;  %v247_v4 = vmul.f32 %v243_v55, %v218_v35 }
  0x72   : > { %v283_v57 = vpop.permute.xlu2 %282 }
  0x7a   : > { %v288_v2 = vpop.permute.xlu2 %287 }
  0x88   : > { %v269_v58 = vpop.permute.xlu1 %268  ;;  %v259_v59 = vpop.permute.xlu0 %258 }
  0x89   : > { %v276_v60 = vmul.f32 %v259_v59, %v244_v56  ;;  %v278_v6 = vmul.f32 %v269_v58, %v246_v3 }
  0x8b   : > { %v300_v61 = vadd.f32 %v283_v57, %v276_v60 }
  0x8d   : > { %304 = vst [vmem:[%s185_s5] sm:$0xff] %v300_v61 }
  0x90   : > { %v274_v63 = vpop.permute.xlu1 %273  ;;  %v264_v0 = vpop.permute.xlu0 %263 }
  0x91   : > { %v277_v1 = vmul.f32 %v264_v0, %v245_v62  ;;  %v279_v7 = vmul.f32 %v274_v63, %v247_v4 }
  0x93   : > { %v301_v5 = vadd.f32 %v288_v2, %v277_v1 }
  0x95   : > { %305 = vst [vmem:[%s185_s5 + $0x8] sm:$0xff] %v301_v5 }
  0x98   : > { %v298_v8 = vpop.permute.xlu1 %297  ;;  %v293_v9 = vpop.permute.xlu0 %292 }
  0x99   : > { %v303_v10 = vadd.f32 %v298_v8, %v279_v7  ;;  %v302_v11 = vadd.f32 %v293_v9, %v278_v6 }
  0x9b   : > { %307 = vst [vmem:[%s185_s5 + $0x18] sm:$0xff] %v303_v10 }
  0x9c   : > { %306 = vst [vmem:[%s185_s5 + $0x10] sm:$0xff] %v302_v11 }
  0x9d   : > { %511 = shalt.err (!%p508_p5)
}
  0x9e   : > { %s566_s29 = smov 128   ;;  %s567_s30 = smov 8  }
  0x9f   : > { %418 = dma.vmem_to_hbm [thread:$0]  (%p628_p4), %s323_s10, 512, %s325_s11, %s309_s15, %s566_s29, %s566_s29, %s567_s30  }
  0xa0 PF: > { %p424_p6 = scmp.ge.s32.totalorder %s562_s17, 2  ;;  %s339_s4 = sand.u32 1, %s542_s12  }
  0xa1   : > { %s340_s5 = scalar_lea.sflag [#allocation3], %s339_s4 }
  0xa2   : > { %p421_p7 = pnand %p424_p6, %p635_p8 }
  0xa4   : > { %p422_p9 = pneg %p421_p7 }
  0xa6   : > { %537 = dma.done.wait (%p422_p9), %s340_s5, 512  }
  0xa7   : > { %539 = vsyncadd (%p422_p9), %s340_s5, 4294966784  ;;  %s16_s17 = sadd.s32 1, %s562_s17   ;;  %s719_s12 = smov %s546_s13 }
  0xa8   : > { %p13_p10 = scmp.ge.s32.totalorder %s16_s17, 4   ;;  %s720_s13 = smov %s550_s14 }
  0xa9   : > { %s721_s14 = smov %s641_s25  ;;  %s722_s15 = smov %s558_s16 }
  0xaa   : > { %s723_s16 = smov %s725_s20  ;;  %15 = sbr.rel (!%p13_p10) target bundleno = 4 (0x4), region = 67 }
  0xaf   :  { %346 = vsyncpa [#allocation3], 1 }
  0xb0   :  { %348 = vsyncpa [#allocation3 + $0x1], 1 }

</bundles_post_ra>
